<compile_context>
chip_gen: v7x
topology: tpu7x:2x2x1
jax: 0.10.0
libtpu: 0.0.40
codegen_flags: <defaults>
</compile_context>

<pallas_src>
import functools

import jax
import jax.numpy as jnp
from jax.experimental import pallas as pl
from jax.experimental.pallas import tpu as pltpu

HIDDEN_IN = 768
HIDDEN_MID = 256
NUM_CLASSES = 4
CLASS_PAD = 128          # lane-dense padded class axis (one full vreg lane width)
NEG_BIAS = -1e30         # bias on padded classes -> exp() underflows to 0
MAX_BLOCK_B = 512        # batch-tile cap; well within VMEM on all target chips


def _mlp_kernel(x_ref, w1_ref, b1_ref, w2_ref, b2_ref, o_ref):
    # fc1: (tb, 768)bf16 @ (768, 256)bf16 -> fp32 accumulation on the MXU.
    h = jnp.dot(x_ref[...], w1_ref[...], preferred_element_type=jnp.float32)
    h = jnp.maximum(h + b1_ref[...], 0.0)  # bias + ReLU in fp32 on the VPU

    # fc2 on the lane-padded class axis: (tb, 256)bf16 @ (256, 128)bf16 -> fp32.
    logits = jnp.dot(h.astype(jnp.bfloat16), w2_ref[...],
                     preferred_element_type=jnp.float32) + b2_ref[...]

    # Numerically stable log_softmax along the class axis. Padded classes carry
    # a -1e30 bias, so they never win the max and contribute exp() == 0.
    m = jnp.max(logits, axis=-1, keepdims=True)
    z = logits - m
    lse = jnp.log(jnp.sum(jnp.exp(z), axis=-1, keepdims=True))
    o_ref[...] = (z - lse).astype(o_ref.dtype)


@functools.partial(jax.jit, static_argnames=("block_b",))
def _model2_forward_impl(x, w1, b1, w2, b2, *, block_b):
    B = x.shape[0]
    n_blocks = pl.cdiv(B, block_b)
    B_pad = n_blocks * block_b

    # bf16 matmul operands (fp32 accumulation happens inside the kernel).
    x_bf = x.astype(jnp.bfloat16)
    w1_bf = w1.astype(jnp.bfloat16)
    if B_pad != B:
        x_bf = jnp.pad(x_bf, ((0, B_pad - B), (0, 0)))

    # Lane-dense fc2: pad the 4-wide class axis to a full 128-lane vreg.
    w2_p = jnp.pad(w2, ((0, 0), (0, CLASS_PAD - NUM_CLASSES))).astype(jnp.bfloat16)
    b2_p = jnp.pad(b2.astype(jnp.float32),
                   ((0, 0), (0, CLASS_PAD - NUM_CLASSES)),
                   constant_values=NEG_BIAS)
    b1_f = b1.astype(jnp.float32)

    out = pl.pallas_call(
        _mlp_kernel,
        out_shape=jax.ShapeDtypeStruct((B_pad, CLASS_PAD), jnp.float32),
        grid_spec=pltpu.PrefetchScalarGridSpec(
            num_scalar_prefetch=0,
            grid=(n_blocks,),
            in_specs=[
                pl.BlockSpec((block_b, HIDDEN_IN), lambda i: (i, 0)),      # x tile
                pl.BlockSpec((HIDDEN_IN, HIDDEN_MID), lambda i: (0, 0)),   # W1 (resident)
                pl.BlockSpec((1, HIDDEN_MID), lambda i: (0, 0)),           # b1
                pl.BlockSpec((HIDDEN_MID, CLASS_PAD), lambda i: (0, 0)),   # W2 (padded)
                pl.BlockSpec((1, CLASS_PAD), lambda i: (0, 0)),            # b2 (padded)
            ],
            out_specs=pl.BlockSpec((block_b, CLASS_PAD), lambda i: (i, 0)),
        ),
        compiler_params=pltpu.CompilerParams(
            dimension_semantics=("parallel",),  # megacore sharding on v7x
        ),
    )(x_bf, w1_bf, b1_f, w2_p, b2_p)

    return out[:B, :NUM_CLASSES]


def model2_forward(x, w1, b1, w2, b2, *, block_b=None):
    """Forward pass of Model2. x: (B, 768) fp32 -> (B, 4) fp32 log-probs.

    If block_b is None, pick the batch tile automatically: a single tile
    (rounded up to a multiple of 8 for the sublane constraint) for small
    batches, MAX_BLOCK_B-row tiles for large ones.
    """
    if block_b is None:
        B = x.shape[0]
        block_b = min(MAX_BLOCK_B, max(8, ((B + 7) // 8) * 8))
    return _model2_forward_impl(x, w1, b1, w2, b2, block_b=block_b)


def init_params(key):
    """Deterministic init mimicking PyTorch nn.Linear default (U[-1/sqrt(fan_in), +])."""
    k1, k2, k3, k4 = jax.random.split(key, 4)
    bound1 = 1.0 / (HIDDEN_IN ** 0.5)
    bound2 = 1.0 / (HIDDEN_MID ** 0.5)
    # Stored transposed relative to PyTorch: (in_features, out_features),
    # so y = x @ W + b matches PyTorch's x @ W.T with W of shape (out, in).
    w1 = jax.random.uniform(k1, (HIDDEN_IN, HIDDEN_MID), jnp.float32, -bound1, bound1)
    b1 = jax.random.uniform(k2, (1, HIDDEN_MID), jnp.float32, -bound1, bound1)
    w2 = jax.random.uniform(k3, (HIDDEN_MID, NUM_CLASSES), jnp.float32, -bound2, bound2)
    b2 = jax.random.uniform(k4, (1, NUM_CLASSES), jnp.float32, -bound2, bound2)
    return w1, b1, w2, b2


def reference_forward(x, w1, b1, w2, b2):
    """Pure-JAX reference mirroring the kernel's precision choices
    (bf16 matmul operands, fp32 accumulation / elementwise)."""
    xb = x.astype(jnp.bfloat16).astype(jnp.float32)
    w1b = w1.astype(jnp.bfloat16).astype(jnp.float32)
    h = jnp.maximum(xb @ w1b + b1, 0.0)
    hb = h.astype(jnp.bfloat16).astype(jnp.float32)
    w2b = w2.astype(jnp.bfloat16).astype(jnp.float32)
    logits = hb @ w2b + b2
    return jax.nn.log_softmax(logits, axis=1)


if __name__ == "__main__":
    key = jax.random.PRNGKey(0)
    kx, kp, kx2 = jax.random.split(key, 3)

    w1, b1, w2, b2 = init_params(kp)

    # Small demo batch (feature sizes 768 -> 256 -> 4 are fixed by the module).
    B = 8
    x = jax.random.normal(kx, (B, HIDDEN_IN), dtype=jnp.float32)
    out = jax.block_until_ready(model2_forward(x, w1, b1, w2, b2))
    ref = reference_forward(x, w1, b1, w2, b2)
    assert out.shape == (B, NUM_CLASSES)
    assert jnp.allclose(out, ref, atol=1e-3, rtol=1e-3), "mismatch vs reference (B=8)"

    # Ragged, multi-block batch: exercises cdiv padding and a >1-step parallel grid.
    B2 = 300
    x2 = jax.random.normal(kx2, (B2, HIDDEN_IN), dtype=jnp.float32)
    out2 = jax.block_until_ready(model2_forward(x2, w1, b1, w2, b2, block_b=128))
    ref2 = reference_forward(x2, w1, b1, w2, b2)
    assert out2.shape == (B2, NUM_CLASSES)
    assert jnp.allclose(out2, ref2, atol=1e-3, rtol=1e-3), "mismatch vs reference (B=300)"

    print("KERNEL_OK")
</pallas_src>

<mosaic_0001>
module attributes {stable_mosaic.version = 11 : i64} {
  func.func @_mlp_kernel(%arg0: i32, %arg1: memref<8x768xbf16, #tpu.memory_space<vmem>>, %arg2: memref<768x256xbf16, #tpu.memory_space<vmem>>, %arg3: memref<1x256xf32, #tpu.memory_space<vmem>>, %arg4: memref<256x128xbf16, #tpu.memory_space<vmem>>, %arg5: memref<1x128xf32, #tpu.memory_space<vmem>>, %arg6: memref<8x128xf32, #tpu.memory_space<vmem>>) attributes {dimension_semantics = [#tpu.dimension_semantics<parallel>], iteration_bounds = array<i64: 1>, scalar_prefetch = 0 : i64, scratch_operands = 0 : i64, tpu.core_type = #tpu.core_type<tc>, window_params = [{transform_indices = @transform_0, window_bounds = array<i64: 8, 768>}, {pipeline_mode = #tpu.pipeline_mode<synchronous>, transform_indices = @transform_1, window_bounds = array<i64: 768, 256>}, {pipeline_mode = #tpu.pipeline_mode<synchronous>, transform_indices = @transform_2, window_bounds = array<i64: 1, 256>}, {pipeline_mode = #tpu.pipeline_mode<synchronous>, transform_indices = @transform_3, window_bounds = array<i64: 256, 128>}, {pipeline_mode = #tpu.pipeline_mode<synchronous>, transform_indices = @transform_4, window_bounds = array<i64: 1, 128>}, {transform_indices = @transform_5, window_bounds = array<i64: 8, 128>}]} {
    %c0 = arith.constant 0 : index
    %c0_0 = arith.constant 0 : index
    %0 = vector.load %arg1[%c0, %c0_0] : memref<8x768xbf16, #tpu.memory_space<vmem>>, vector<8x768xbf16>
    %c0_1 = arith.constant 0 : index
    %c0_2 = arith.constant 0 : index
    %1 = vector.load %arg2[%c0_1, %c0_2] : memref<768x256xbf16, #tpu.memory_space<vmem>>, vector<768x256xbf16>
    %cst = arith.constant dense<0.000000e+00> : vector<8x256xf32>
    %2 = tpu.matmul %0, %1, %cst {dimension_numbers = #tpu.dot_dimension_numbers<[1], [0], [0], [1], [0, 0, 1, 1], [], []>} : vector<8x768xbf16>, vector<768x256xbf16>, vector<8x256xf32> -> vector<8x256xf32>
    %c0_3 = arith.constant 0 : index
    %c0_4 = arith.constant 0 : index
    %3 = vector.load %arg3[%c0_3, %c0_4] : memref<1x256xf32, #tpu.memory_space<vmem>>, vector<1x256xf32>
    %4 = vector.broadcast %3 : vector<1x256xf32> to vector<8x256xf32>
    %5 = arith.addf %2, %4 : vector<8x256xf32>
    %cst_5 = arith.constant 0.000000e+00 : f32
    %6 = vector.broadcast %cst_5 : f32 to vector<8x256xf32>
    %7 = arith.maximumf %5, %6 : vector<8x256xf32>
    %8 = arith.truncf %7 : vector<8x256xf32> to vector<8x256xbf16>
    %c0_6 = arith.constant 0 : index
    %c0_7 = arith.constant 0 : index
    %9 = vector.load %arg4[%c0_6, %c0_7] : memref<256x128xbf16, #tpu.memory_space<vmem>>, vector<256x128xbf16>
    %cst_8 = arith.constant dense<0.000000e+00> : vector<8x128xf32>
    %10 = tpu.matmul %8, %9, %cst_8 {dimension_numbers = #tpu.dot_dimension_numbers<[1], [0], [0], [1], [0, 0, 1, 1], [], []>} : vector<8x256xbf16>, vector<256x128xbf16>, vector<8x128xf32> -> vector<8x128xf32>
    %c0_9 = arith.constant 0 : index
    %c0_10 = arith.constant 0 : index
    %11 = vector.load %arg5[%c0_9, %c0_10] : memref<1x128xf32, #tpu.memory_space<vmem>>, vector<1x128xf32>
    %12 = vector.broadcast %11 : vector<1x128xf32> to vector<8x128xf32>
    %13 = arith.addf %10, %12 : vector<8x128xf32>
    %cst_11 = arith.constant dense<0xFF800000> : vector<8xf32>
    %14 = vector.multi_reduction <maximumf>, %13, %cst_11 [1] : vector<8x128xf32> to vector<8xf32>
    %15 = vector.shape_cast %14 : vector<8xf32> to vector<8x1xf32>
    %16 = vector.broadcast %15 : vector<8x1xf32> to vector<8x128xf32>
    %17 = arith.subf %13, %16 : vector<8x128xf32>
    %18 = math.exp %17 : vector<8x128xf32>
    %cst_12 = arith.constant dense<0.000000e+00> : vector<8xf32>
    %19 = vector.multi_reduction <add>, %18, %cst_12 [1] : vector<8x128xf32> to vector<8xf32>
    %20 = vector.shape_cast %19 : vector<8xf32> to vector<8x1xf32>
    %21 = math.log %20 : vector<8x1xf32>
    %22 = vector.broadcast %21 : vector<8x1xf32> to vector<8x128xf32>
    %23 = arith.subf %17, %22 : vector<8x128xf32>
    %c0_13 = arith.constant 0 : index
    %c0_14 = arith.constant 0 : index
    %24 = vector.load %arg6[%c0_13, %c0_14] : memref<8x128xf32, #tpu.memory_space<vmem>>, vector<8x128xf32>
    tpu.vector_store %arg6[%c0_13, %c0_14], %23 {strides = array<i32>} : memref<8x128xf32, #tpu.memory_space<vmem>>, vector<8x128xf32>,
    return
  }
  func.func @transform_0(%arg0: i32) -> (i32, i32) {
    %c0_i32 = arith.constant 0 : i32
    %c0_i32_0 = arith.constant 0 : i32
    return %arg0, %c0_i32 : i32, i32
  }
  func.func @transform_1(%arg0: i32) -> (i32, i32) {
    %c0_i32 = arith.constant 0 : i32
    %c0_i32_0 = arith.constant 0 : i32
    %c0_i32_1 = arith.constant 0 : i32
    return %c0_i32, %c0_i32_0 : i32, i32
  }
  func.func @transform_2(%arg0: i32) -> (i32, i32) {
    %c0_i32 = arith.constant 0 : i32
    %c0_i32_0 = arith.constant 0 : i32
    %c0_i32_1 = arith.constant 0 : i32
    return %c0_i32, %c0_i32_0 : i32, i32
  }
  func.func @transform_3(%arg0: i32) -> (i32, i32) {
    %c0_i32 = arith.constant 0 : i32
    %c0_i32_0 = arith.constant 0 : i32
    %c0_i32_1 = arith.constant 0 : i32
    return %c0_i32, %c0_i32_0 : i32, i32
  }
  func.func @transform_4(%arg0: i32) -> (i32, i32) {
    %c0_i32 = arith.constant 0 : i32
    %c0_i32_0 = arith.constant 0 : i32
    %c0_i32_1 = arith.constant 0 : i32
    return %c0_i32, %c0_i32_0 : i32, i32
  }
  func.func @transform_5(%arg0: i32) -> (i32, i32) {
    %c0_i32 = arith.constant 0 : i32
    %c0_i32_0 = arith.constant 0 : i32
    return %arg0, %c0_i32 : i32, i32
  }
}

</mosaic_0001>

<bundles_post_ra>
// kernel: _model2_forward_impl.1
= control target key start
LH: loop header
LB: loop body
LE: loop exit
PB: predicated region body
PF: predicated region fallthrough
CT: control target
= control target key end

     0   :  { %s1665_s1 = inlined_call_operand.vmem [shape: bf16[768,256], index: 1, kind: input, shape index: {}]   ;;  %s1666_s0 = inlined_call_operand.vmem [shape: bf16[8,768], index: 0, kind: input, shape index: {}]   ;;  %s1667_s3 = inlined_call_operand.vmem [shape: bf16[256,128], index: 3, kind: input, shape index: {}]   ;;  %s1668_s2 = inlined_call_operand.vmem [shape: f32[1,256], index: 2, kind: input, shape index: {}]   ;;  %s1669_s4 = inlined_call_operand.vmem [shape: f32[1,128], index: 4, kind: input, shape index: {}]   ;;  %s1670_s5 = inlined_call_operand.vmem [shape: f32[8,128], index: 5, kind: output, shape index: {}]  }
   0x1   :  { %v1099_v0 = vld [vmem:[%s1665_s1 + $0x104] ss:$8 sps:$4 sm:$0xff]   ;;  %v1101_v1 = vld [vmem:[%s1665_s1 + $0x100] ss:$8 sps:$4 sm:$0xff]   ;;  %v1102_v2 = vld [vmem:[%s1665_s1 + $0x114] ss:$8 sps:$4 sm:$0xff]  }
   0x2   :  { %674 = vmatprep.subr.bf16.mxu0 %v1099_v0  ;;  %v1104_v3 = vld [vmem:[%s1665_s1 + $0x110] ss:$8 sps:$4 sm:$0xff]   ;;  %v1105_v4 = vld [vmem:[%s1665_s1 + $0x124] ss:$8 sps:$4 sm:$0xff]   ;;  %v1107_v5 = vld [vmem:[%s1665_s1 + $0x120] ss:$8 sps:$4 sm:$0xff]  }
   0x3   :  { %675 = vmatpush1.bf16.msra.mxu0 %v1101_v1  ;;  %v1108_v6 = vld [vmem:[%s1665_s1 + $0x134] ss:$8 sps:$4 sm:$0xff]   ;;  %v1110_v7 = vld [vmem:[%s1665_s1 + $0x130] ss:$8 sps:$4 sm:$0xff]   ;;  %v1111_v8 = vld [vmem:[%s1665_s1 + $0x144] ss:$8 sps:$4 sm:$0xff]  }
   0x4   :  { %676 = vmatprep.subr.bf16.mxu0 %v1102_v2  ;;  %v1113_v9 = vld [vmem:[%s1665_s1 + $0x140] ss:$8 sps:$4 sm:$0xff]   ;;  %v1114_v10 = vld [vmem:[%s1665_s1 + $0x154] ss:$8 sps:$4 sm:$0xff]   ;;  %v1116_v11 = vld [vmem:[%s1665_s1 + $0x150] ss:$8 sps:$4 sm:$0xff]  }
   0x5   :  { %v1117_v12 = vld [vmem:[%s1665_s1 + $0x164] ss:$8 sps:$4 sm:$0xff]   ;;  %v1146_v14 = vld [vmem:[%s1665_s1] ss:$8 sps:$4 sm:$0xff]   ;;  %v1120_v16 = vld [vmem:[%s1665_s1 + $0x174] ss:$8 sps:$4 sm:$0xff]  }
   0x6   :  { %v1144_v13 = vld [vmem:[%s1665_s1 + $0x4] ss:$8 sps:$4 sm:$0xff]   ;;  %v1119_v15 = vld [vmem:[%s1665_s1 + $0x160] ss:$8 sps:$4 sm:$0xff]   ;;  %v1150_v17 = vld [vmem:[%s1665_s1 + $0x14] ss:$8 sps:$4 sm:$0xff]  }
   0x7   :  { %677 = vmatpush1.bf16.msra.mxu0 %v1104_v3  ;;  %633 = vmatprep.subr.bf16.mxu1 %v1144_v13  ;;  %v1152_v18 = vld [vmem:[%s1665_s1 + $0x10] ss:$8 sps:$4 sm:$0xff]   ;;  %v1359_v19 = vld [vmem:[%s1666_s0 + $0x8] sm:$0xff]  ;;  %v1164_v25 = vld [vmem:[%s1665_s1 + $0x34] ss:$8 sps:$4 sm:$0xff]  }
   0x8   :  { %678 = vmatprep.subr.bf16.mxu0 %v1105_v4  ;;  %634 = vmatpush1.bf16.msra.mxu1 %v1146_v14  ;;  %v953_v20 = vcombine.high %v1359_v19, %v1359_v19  ;;  %v1122_v21 = vld [vmem:[%s1665_s1 + $0x170] ss:$8 sps:$4 sm:$0xff]   ;;  %v1158_v22 = vld [vmem:[%s1665_s1 + $0x24] ss:$8 sps:$4 sm:$0xff]   ;;  %v1160_v23 = vld [vmem:[%s1665_s1 + $0x20] ss:$8 sps:$4 sm:$0xff]   ;;  %v952_v58 = vcombine.low %v1359_v19, %v1359_v19 }
   0x9   :  { %635 = vmatprep.subr.bf16.mxu1 %v1150_v17  ;;  %v1123_v24 = vld [vmem:[%s1665_s1 + $0x184] ss:$8 sps:$4 sm:$0xff]   ;;  %v1125_v26 = vld [vmem:[%s1665_s1 + $0x180] ss:$8 sps:$4 sm:$0xff]   ;;  %v1126_v27 = vld [vmem:[%s1665_s1 + $0x194] ss:$8 sps:$4 sm:$0xff]  }
   0xa   :  { %706 = vmatprep.mubr.bf16.mxu0 %v953_v20  ;;  %v1166_v28 = vld [vmem:[%s1665_s1 + $0x30] ss:$8 sps:$4 sm:$0xff]   ;;  %v1170_v29 = vld [vmem:[%s1665_s1 + $0x44] ss:$8 sps:$4 sm:$0xff]   ;;  %v1172_v32 = vld [vmem:[%s1665_s1 + $0x40] ss:$8 sps:$4 sm:$0xff]  }
   0xb   :  { %679 = vmatpush1.bf16.msra.mxu0 %v1107_v5  ;;  %v1128_v30 = vld [vmem:[%s1665_s1 + $0x190] ss:$8 sps:$4 sm:$0xff]   ;;  %v1129_v31 = vld [vmem:[%s1665_s1 + $0x1a4] ss:$8 sps:$4 sm:$0xff]   ;;  %v1176_v33 = vld [vmem:[%s1665_s1 + $0x54] ss:$8 sps:$4 sm:$0xff]  }
   0xc   :  { %680 = vmatprep.subr.bf16.mxu0 %v1108_v6  ;;  %636 = vmatpush1.bf16.msra.mxu1 %v1152_v18  ;;  %v1131_v34 = vld [vmem:[%s1665_s1 + $0x1a0] ss:$8 sps:$4 sm:$0xff]   ;;  %v1132_v35 = vld [vmem:[%s1665_s1 + $0x1b4] ss:$8 sps:$4 sm:$0xff]   ;;  %v1178_v36 = vld [vmem:[%s1665_s1 + $0x50] ss:$8 sps:$4 sm:$0xff]  }
   0xd   :  { %637 = vmatprep.subr.bf16.mxu1 %v1158_v22  ;;  %v1182_v37 = vld [vmem:[%s1665_s1 + $0x64] ss:$8 sps:$4 sm:$0xff]   ;;  %v1134_v38 = vld [vmem:[%s1665_s1 + $0x1b0] ss:$8 sps:$4 sm:$0xff]   ;;  %v1184_v40 = vld [vmem:[%s1665_s1 + $0x60] ss:$8 sps:$4 sm:$0xff]  }
   0xe   :  { %v1135_v39 = vld [vmem:[%s1665_s1 + $0x1c4] ss:$8 sps:$4 sm:$0xff]   ;;  %v1188_v41 = vld [vmem:[%s1665_s1 + $0x74] ss:$8 sps:$4 sm:$0xff]   ;;  %v1137_v42 = vld [vmem:[%s1665_s1 + $0x1c0] ss:$8 sps:$4 sm:$0xff]  }
   0xf   :  { %681 = vmatpush1.bf16.msra.mxu0 %v1110_v7  ;;  %v1138_v43 = vld [vmem:[%s1665_s1 + $0x1d4] ss:$8 sps:$4 sm:$0xff]   ;;  %v1190_v44 = vld [vmem:[%s1665_s1 + $0x70] ss:$8 sps:$4 sm:$0xff]   ;;  %v1194_v45 = vld [vmem:[%s1665_s1 + $0x84] ss:$8 sps:$4 sm:$0xff]  }
  0x10   :  { %682 = vmatprep.subr.bf16.mxu0 %v1111_v8  ;;  %638 = vmatpush1.bf16.msra.mxu1 %v1160_v23  ;;  %v1140_v46 = vld [vmem:[%s1665_s1 + $0x1d0] ss:$8 sps:$4 sm:$0xff]   ;;  %v1141_v47 = vld [vmem:[%s1665_s1 + $0x1e4] ss:$8 sps:$4 sm:$0xff]   ;;  %v1196_v48 = vld [vmem:[%s1665_s1 + $0x80] ss:$8 sps:$4 sm:$0xff]  }
  0x11   :  { %639 = vmatprep.subr.bf16.mxu1 %v1164_v25  ;;  %v1200_v49 = vld [vmem:[%s1665_s1 + $0x94] ss:$8 sps:$4 sm:$0xff]   ;;  %v1143_v50 = vld [vmem:[%s1665_s1 + $0x1e0] ss:$8 sps:$4 sm:$0xff]   ;;  %v1202_v52 = vld [vmem:[%s1665_s1 + $0x90] ss:$8 sps:$4 sm:$0xff]  }
  0x12   :  { %v1147_v51 = vld [vmem:[%s1665_s1 + $0x1f4] ss:$8 sps:$4 sm:$0xff]   ;;  %v1206_v53 = vld [vmem:[%s1665_s1 + $0xa4] ss:$8 sps:$4 sm:$0xff]   ;;  %v1149_v54 = vld [vmem:[%s1665_s1 + $0x1f0] ss:$8 sps:$4 sm:$0xff]  }
  0x13   :  { %683 = vmatpush1.bf16.msra.mxu0 %v1113_v9  ;;  %v1157_v55 = vld [vmem:[%s1665_s1 + $0x204] ss:$8 sps:$4 sm:$0xff]   ;;  %v1208_v56 = vld [vmem:[%s1665_s1 + $0xa0] ss:$8 sps:$4 sm:$0xff]   ;;  %v1212_v57 = vld [vmem:[%s1665_s1 + $0xb4] ss:$8 sps:$4 sm:$0xff]  }
  0x14   :  { %684 = vmatprep.subr.bf16.mxu0 %v1114_v10  ;;  %640 = vmatpush1.bf16.msra.mxu1 %v1166_v28  ;;  %v1155_v59 = vld [vmem:[%s1665_s1 + $0x200] ss:$8 sps:$4 sm:$0xff]   ;;  %v1214_v60 = vld [vmem:[%s1665_s1 + $0xb0] ss:$8 sps:$4 sm:$0xff]   ;;  %v1163_v62 = vld [vmem:[%s1665_s1 + $0x214] ss:$8 sps:$4 sm:$0xff]  }
  0x15   :  { %641 = vmatprep.subr.bf16.mxu1 %v1170_v29  ;;  %v21_v61 = vld [vmem:[%s1666_s0] sm:$0xff]  ;;  %v1494_v1 = vld [vmem:[%s1666_s0 + $0x10] sm:$0xff]  ;;  %v1251_v23 = vld [vmem:[%s1667_s3 + $0x48] sm:$0xff]  }
  0x16   :  { %v1218_v63 = vld [vmem:[%s1665_s1 + $0xc4] ss:$8 sps:$4 sm:$0xff]   ;;  %v951_v0 = vcombine.high %v21_v61, %v21_v61  ;;  %v1161_v2 = vld [vmem:[%s1665_s1 + $0x210] ss:$8 sps:$4 sm:$0xff]   ;;  %v955_v3 = vcombine.high %v1494_v1, %v1494_v1  ;;  %v1220_v5 = vld [vmem:[%s1665_s1 + $0xc0] ss:$8 sps:$4 sm:$0xff]   ;;  %v950_v19 = vcombine.low %v21_v61, %v21_v61  ;;  %v122_v61 = vlaneseq }
  0x17   :  { %685 = vmatpush1.bf16.msra.mxu0 %v1116_v11  ;;  %v1169_v4 = vld [vmem:[%s1665_s1 + $0x224] ss:$8 sps:$4 sm:$0xff]   ;;  %v1224_v6 = vld [vmem:[%s1665_s1 + $0xd4] ss:$8 sps:$4 sm:$0xff]   ;;  %v1167_v7 = vld [vmem:[%s1665_s1 + $0x220] ss:$8 sps:$4 sm:$0xff]  }
  0x18   :  { %686 = vmatprep.subr.bf16.mxu0 %v1117_v12  ;;  %642 = vmatpush1.bf16.msra.mxu1 %v1172_v32  ;;  %v1175_v8 = vld [vmem:[%s1665_s1 + $0x234] ss:$8 sps:$4 sm:$0xff]   ;;  %v1226_v9 = vld [vmem:[%s1665_s1 + $0xd0] ss:$8 sps:$4 sm:$0xff]   ;;  %v1230_v10 = vld [vmem:[%s1665_s1 + $0xe4] ss:$8 sps:$4 sm:$0xff]  }
  0x19   :  { %643 = vmatprep.subr.bf16.mxu1 %v1176_v33  ;;  %665 = vmatprep.mubr.bf16.mxu1 %v951_v0  ;;  %v1173_v11 = vld [vmem:[%s1665_s1 + $0x230] ss:$8 sps:$4 sm:$0xff]   ;;  %v1181_v12 = vld [vmem:[%s1665_s1 + $0x244] ss:$8 sps:$4 sm:$0xff]   ;;  %v1232_v13 = vld [vmem:[%s1665_s1 + $0xe0] ss:$8 sps:$4 sm:$0xff]  }
  0x1a   :  { %v1236_v14 = vld [vmem:[%s1665_s1 + $0xf4] ss:$8 sps:$4 sm:$0xff]   ;;  %v1249_v18 = vld [vmem:[%s1667_s3 + $0x40] sm:$0xff]   ;;  %v1185_v20 = vld [vmem:[%s1665_s1 + $0x250] ss:$8 sps:$4 sm:$0xff]  }
  0x1b   :  { %687 = vmatpush1.bf16.msra.mxu0 %v1119_v15  ;;  %v1179_v15 = vld [vmem:[%s1665_s1 + $0x240] ss:$8 sps:$4 sm:$0xff]   ;;  %v1187_v17 = vld [vmem:[%s1665_s1 + $0x254] ss:$8 sps:$4 sm:$0xff]   ;;  %v1193_v22 = vld [vmem:[%s1665_s1 + $0x264] ss:$8 sps:$4 sm:$0xff]  }
  0x1c   :  { %688 = vmatprep.subr.bf16.mxu0 %v1120_v16  ;;  %644 = vmatpush1.bf16.msra.mxu1 %v1178_v36  ;;  %v1238_v16 = vld [vmem:[%s1665_s1 + $0xf0] ss:$8 sps:$4 sm:$0xff]   ;;  %v1252_v25 = vld [vmem:[%s1667_s3 + $0x8] sm:$0xff]   ;;  %v120_v0 = vld [vmem:[%s1668_s2] sm:$0x3] }
  0x1d   :  { %645 = vmatprep.subr.bf16.mxu1 %v1182_v37  ;;  %v1197_v28 = vld [vmem:[%s1665_s1 + $0x270] ss:$8 sps:$4 sm:$0xff]   ;;  %v1203_v32 = vld [vmem:[%s1665_s1 + $0x280] ss:$8 sps:$4 sm:$0xff]  }
  0x1e   :  { %v1254_v29 = vld [vmem:[%s1667_s3 + $0x10] sm:$0xff]   ;;  %v1256_v33 = vld [vmem:[%s1667_s3 + $0x18] sm:$0xff]   ;;  %v1258_v37 = vld [vmem:[%s1667_s3 + $0x20] sm:$0xff]  }
  0x1f   :  { %689 = vmatpush1.bf16.msra.mxu0 %v1122_v21  ;;  %v1250_v21 = vld [vmem:[%s1667_s3] sm:$0xff]   ;;  %v1209_v36 = vld [vmem:[%s1665_s1 + $0x290] ss:$8 sps:$4 sm:$0xff]  }
  0x20   :  { %690 = vmatprep.subr.bf16.mxu0 %v1123_v24  ;;  %646 = vmatpush1.bf16.msra.mxu1 %v1184_v40  ;;  %v1191_v24 = vld [vmem:[%s1665_s1 + $0x260] ss:$8 sps:$4 sm:$0xff]   ;;  %v1223_v40 = vld [vmem:[%s1665_s1 + $0x2b4] ss:$8 sps:$4 sm:$0xff]  }
  0x21   :  { %647 = vmatprep.subr.bf16.mxu1 %v1188_v41  ;;  %v1221_v41 = vld [vmem:[%s1665_s1 + $0x2b0] ss:$8 sps:$4 sm:$0xff]  }
  0x23   :  { %691 = vmatpush1.bf16.msra.mxu0 %v1125_v26  ;;  %v1199_v26 = vld [vmem:[%s1665_s1 + $0x274] ss:$8 sps:$4 sm:$0xff]  }
  0x24   :  { %692 = vmatprep.subr.bf16.mxu0 %v1126_v27  ;;  %648 = vmatpush1.bf16.msra.mxu1 %v1190_v44  ;;  %v1253_v27 = vld [vmem:[%s1667_s3 + $0x50] sm:$0xff]  }
  0x25   :  { %649 = vmatprep.subr.bf16.mxu1 %v1194_v45  ;;  %v1235_v44 = vld [vmem:[%s1665_s1 + $0x2d4] ss:$8 sps:$4 sm:$0xff]   ;;  %v1233_v45 = vld [vmem:[%s1665_s1 + $0x2d0] ss:$8 sps:$4 sm:$0xff]  }
  0x27   :  { %693 = vmatpush1.bf16.msra.mxu0 %v1128_v30  ;;  %v1205_v30 = vld [vmem:[%s1665_s1 + $0x284] ss:$8 sps:$4 sm:$0xff]  }
  0x28   :  { %694 = vmatprep.subr.bf16.mxu0 %v1129_v31  ;;  %650 = vmatpush1.bf16.msra.mxu1 %v1196_v48  ;;  %v1255_v31 = vld [vmem:[%s1667_s3 + $0x58] sm:$0xff]  }
  0x29   :  { %651 = vmatprep.subr.bf16.mxu1 %v1200_v49  ;;  %v1246_v48 = vld [vmem:[%s1665_s1 + $0x2f4] ss:$8 sps:$4 sm:$0xff]   ;;  %v1244_v49 = vld [vmem:[%s1665_s1 + $0x2f0] ss:$8 sps:$4 sm:$0xff]  }
  0x2b   :  { %695 = vmatpush1.bf16.msra.mxu0 %v1131_v34  ;;  %v1211_v34 = vld [vmem:[%s1665_s1 + $0x294] ss:$8 sps:$4 sm:$0xff]  }
  0x2c   :  { %696 = vmatprep.subr.bf16.mxu0 %v1132_v35  ;;  %652 = vmatpush1.bf16.msra.mxu1 %v1202_v52  ;;  %v1257_v35 = vld [vmem:[%s1667_s3 + $0x60] sm:$0xff]   ;;  %v1260_v52 = vld [vmem:[%s1667_s3 + $0x28] sm:$0xff]  }
  0x2d   :  { %653 = vmatprep.subr.bf16.mxu1 %v1206_v53  ;;  %v1261_v53 = vld [vmem:[%s1667_s3 + $0x70] sm:$0xff]  }
  0x2f   :  { %697 = vmatpush1.bf16.msra.mxu0 %v1134_v38  ;;  %v1217_v38 = vld [vmem:[%s1665_s1 + $0x2a4] ss:$8 sps:$4 sm:$0xff]  }
  0x30   :  { %698 = vmatprep.subr.bf16.mxu0 %v1135_v39  ;;  %654 = vmatpush1.bf16.msra.mxu1 %v1208_v56  ;;  %v1215_v39 = vld [vmem:[%s1665_s1 + $0x2a0] ss:$8 sps:$4 sm:$0xff]   ;;  %v1264_v56 = vld [vmem:[%s1667_s3 + $0x38] sm:$0xff]  }
  0x31   :  { %655 = vmatprep.subr.bf16.mxu1 %v1212_v57 }
  0x33   :  { %699 = vmatpush1.bf16.msra.mxu0 %v1137_v42  ;;  %v1229_v42 = vld [vmem:[%s1665_s1 + $0x2c4] ss:$8 sps:$4 sm:$0xff]  }
  0x34   :  { %700 = vmatprep.subr.bf16.mxu0 %v1138_v43  ;;  %656 = vmatpush1.bf16.msra.mxu1 %v1214_v60  ;;  %v1227_v43 = vld [vmem:[%s1665_s1 + $0x2c0] ss:$8 sps:$4 sm:$0xff]  }
  0x35   :  { %657 = vmatprep.subr.bf16.mxu1 %v1218_v63 }
  0x37   :  { %701 = vmatpush1.bf16.msra.mxu0 %v1140_v46  ;;  %v1241_v46 = vld [vmem:[%s1665_s1 + $0x2e4] ss:$8 sps:$4 sm:$0xff]  }
  0x38   :  { %702 = vmatprep.subr.bf16.mxu0 %v1141_v47  ;;  %658 = vmatpush1.bf16.msra.mxu1 %v1220_v5  ;;  %v1239_v47 = vld [vmem:[%s1665_s1 + $0x2e0] ss:$8 sps:$4 sm:$0xff]  }
  0x39   :  { %659 = vmatprep.subr.bf16.mxu1 %v1224_v6 }
  0x3b   :  { %703 = vmatpush1.bf16.msra.mxu0 %v1143_v50  ;;  %v954_v50 = vcombine.low %v1494_v1, %v1494_v1 }
  0x3c   :  { %704 = vmatprep.subr.bf16.mxu0 %v1147_v51  ;;  %660 = vmatpush1.bf16.msra.mxu1 %v1226_v9  ;;  %v1259_v51 = vld [vmem:[%s1667_s3 + $0x68] sm:$0xff]  }
  0x3d   :  { %661 = vmatprep.subr.bf16.mxu1 %v1230_v10 }
  0x3f   :  { %705 = vmatpush1.bf16.msra.mxu0 %v1149_v54  ;;  %v1262_v54 = vld [vmem:[%s1667_s3 + $0x30] sm:$0xff]  }
  0x40   :  { %715 = vmatprep.subr.bf16.mxu0 %v1157_v55  ;;  %662 = vmatpush1.bf16.msra.mxu1 %v1232_v13  ;;  %v1263_v55 = vld [vmem:[%s1667_s3 + $0x78] sm:$0xff]  }
  0x41   :  { %663 = vmatprep.subr.bf16.mxu1 %v1236_v14 }
  0x42   :  { %707 = vmatmul.mubr.bf16.vlgmr.msra.gmra.mrb[0].mxu0 %v952_v58 }
  0x43   :  { %716 = vmatpush1.bf16.msra.mxu0 %v1155_v59  ;;  %747 = vmatprep.mubr.bf16.mxu0 %v955_v3 }
  0x44   :  { %717 = vmatprep.subr.bf16.mxu0 %v1163_v62  ;;  %664 = vmatpush1.bf16.msra.mxu1 %v1238_v16  ;;  %v123_v62 = vshrl.u32 %v122_v61, 7 }
  0x45   :  { %1069 = vmatprep.subr.bf16.mxu1 %v1249_v18  ;;  %v1052_v18 = vld [vmem:[%s1669_s4] ss:$0 sm:$0xff] }
  0x46   :  { %v124_v63 = vsub.s32 0, %v123_v62  ;;  %v128_v1 = vsub.s32 1, %v123_v62 }
  0x47   :  { %718 = vmatpush1.bf16.msra.mxu0 %v1161_v2  ;;  %666 = vmatmul.mubr.bf16.vlgmr.msra.gmra.mrb[0].mxu1 %v950_v19 }
  0x48   :  { %719 = vmatprep.subr.bf16.mxu0 %v1169_v4  ;;  %1070 = vmatpush3.bf16.msra.mxu1 %v1250_v21  ;;  %v125_v2 = vrot.slane %v120_v0, %v124_v63  ;;  %v129_v3 = vrot.slane %v120_v0, %v128_v1 }
  0x49   :  { %1071 = vmatprep.subr.bf16.mxu1 %v1251_v23 }
  0x4b   :  { %720 = vmatpush1.bf16.msra.mxu0 %v1167_v7 }
  0x4c   :  { %721 = vmatprep.subr.bf16.mxu0 %v1175_v8  ;;  %1072 = vmatpush3.bf16.msra.mxu1 %v1252_v25 }
  0x4d   :  { %1073 = vmatprep.subr.bf16.mxu1 %v1253_v27 }
  0x4f   :  { %722 = vmatpush1.bf16.msra.mxu0 %v1173_v11 }
  0x50   :  { %723 = vmatprep.subr.bf16.mxu0 %v1181_v12  ;;  %1074 = vmatpush3.bf16.msra.mxu1 %v1254_v29 }
  0x51   :  { %1075 = vmatprep.subr.bf16.mxu1 %v1255_v31 }
  0x53   :  { %724 = vmatpush1.bf16.msra.mxu0 %v1179_v15 }
  0x54   :  { %725 = vmatprep.subr.bf16.mxu0 %v1187_v17  ;;  %1076 = vmatpush3.bf16.msra.mxu1 %v1256_v33 }
  0x55   :  { %1077 = vmatprep.subr.bf16.mxu1 %v1257_v35 }
  0x57   :  { %726 = vmatpush1.bf16.msra.mxu0 %v1185_v20 }
  0x58   :  { %727 = vmatprep.subr.bf16.mxu0 %v1193_v22  ;;  %1078 = vmatpush3.bf16.msra.mxu1 %v1258_v37 }
  0x59   :  { %1079 = vmatprep.subr.bf16.mxu1 %v1259_v51 }
  0x5b   :  { %728 = vmatpush1.bf16.msra.mxu0 %v1191_v24 }
  0x5c   :  { %729 = vmatprep.subr.bf16.mxu0 %v1199_v26  ;;  %1080 = vmatpush3.bf16.msra.mxu1 %v1260_v52 }
  0x5d   :  { %1081 = vmatprep.subr.bf16.mxu1 %v1261_v53 }
  0x5f   :  { %730 = vmatpush1.bf16.msra.mxu0 %v1197_v28 }
  0x60   :  { %731 = vmatprep.subr.bf16.mxu0 %v1205_v30  ;;  %1082 = vmatpush3.bf16.msra.mxu1 %v1262_v54 }
  0x61   :  { %1083 = vmatprep.subr.bf16.mxu1 %v1263_v55 }
  0x63   :  { %732 = vmatpush1.bf16.msra.mxu0 %v1203_v32 }
  0x64   :  { %733 = vmatprep.subr.bf16.mxu0 %v1211_v34  ;;  %1084 = vmatpush3.bf16.msra.mxu1 %v1264_v56 }
  0x67   :  { %734 = vmatpush1.bf16.msra.mxu0 %v1209_v36 }
  0x68   :  { %735 = vmatprep.subr.bf16.mxu0 %v1217_v38 }
  0x6b   :  { %736 = vmatpush1.bf16.msra.mxu0 %v1215_v39 }
  0x6c   :  { %737 = vmatprep.subr.bf16.mxu0 %v1223_v40 }
  0x6f   :  { %738 = vmatpush1.bf16.msra.mxu0 %v1221_v41 }
  0x70   :  { %739 = vmatprep.subr.bf16.mxu0 %v1229_v42 }
  0x73   :  { %740 = vmatpush1.bf16.msra.mxu0 %v1227_v43 }
  0x74   :  { %741 = vmatprep.subr.bf16.mxu0 %v1235_v44 }
  0x77   :  { %742 = vmatpush1.bf16.msra.mxu0 %v1233_v45 }
  0x78   :  { %743 = vmatprep.subr.bf16.mxu0 %v1241_v46 }
  0x7b   :  { %744 = vmatpush1.bf16.msra.mxu0 %v1239_v47 }
  0x7c   :  { %745 = vmatprep.subr.bf16.mxu0 %v1246_v48 }
  0x7f   :  { %746 = vmatpush1.bf16.msra.mxu0 %v1244_v49 }
  0x82   :  { %748 = vmatmul.mubr.bf16.vlgmr.msra.gmra.mrb[0].mxu0 %v954_v50 }
 0x11a   :  { %v667_v57 = vpop.f32.mrb[0].mxu1 }
 0x11b   :  { %v669_v58 = vpop.f32.mrb[1].mxu1  ;;  %v668_v4 = vadd.f32 %v667_v57, %v125_v2 }
 0x11c   :  { %v671_v59 = vpop.f32.mrb[2].mxu1  ;;  %v670_v5 = vadd.f32 %v669_v58, %v129_v3 }
 0x11d   :  { %v672_v60 = vpop.f32.mrb[3].mxu1 }
 0x155   :  { %v749_v6 = vpop.f32.mrb[0].mxu0 }
 0x156   :  { %v1092_v7 = vadd.f32 %v749_v6, %v668_v4  ;;  %v751_v8 = vpop.f32.mrb[1].mxu0 }
 0x157   :  { %v1094_v9 = vadd.f32 %v751_v8, %v670_v5  ;;  %v753_v10 = vpop.f32.mrb[2].mxu0 }
 0x158   :  { %v756_v11 = vmax.f32 %v1092_v7, 0.0  ;;  %v754_v12 = vpop.f32.mrb[3].mxu0 }
 0x159   :  { %v757_v13 = vmax.f32 %v1094_v9, 0.0 }
 0x15a   :  { %v758_v15 = vpack.c.bf16 %v756_v11, %v756_v11 }
 0x15b   :  { %v759_v14 = vpack.c.bf16 %v757_v13, %v757_v13 }
 0x15d   :  { %927 = vmatprep.mubr.bf16.mxu1 %v759_v14 }
 0x15e   :  { %928 = vmatmul.mubr.bf16.vlgmr.msra.gmra.mrb[4].mxu1 %v758_v15 }
 0x231   :  { %v1085_v16 = vpop.f32.mrb[4].mxu1 }
 0x232   :  { %v1086_v17 = vpop.f32.mrb[5].mxu1 }
 0x233   :  { %v1087_v19 = vadd.f32 %v1086_v17, %v1085_v16  ;;  %v1088_v20 = vpop.f32.mrb[6].mxu1 }
 0x234   :  { %v1089_v21 = vpop.f32.mrb[7].mxu1 }
 0x235   :  { %v930_v22 = vadd.f32 %v1087_v19, %v1052_v18 }
 0x237   :  { %935 = vmax.xlane.f32.xlu0 %v930_v22 }
 0x2c4   :  { %v936_v23 = vpop.xlane.xlu0 %935 }
 0x2c5   :  { %v937_v24 = vsub.f32 %v930_v22, %v936_v23 }
 0x2c7   :  { %v938_v25 = vmul.f32 1.442695, %v937_v24 }
 0x2c9   :  { %1265 = vpow2.f32 %v938_v25 }
 0x2d3   :  { %v1266_v26 = vpop.eup %1265 }
 0x2d4   :  { %940 = vadd.xlane.f32.xlu0 %v1266_v26 }
 0x361   :  { %v941_v27 = vpop.xlane.xlu0 %940 }
 0x362   :  { %1267 = vlog2.f32 %v941_v27 }
 0x36c   :  { %v1268_v28 = vpop.eup %1267 }
 0x36d   :  { %v943_v29 = vmul.f32 0.6931472, %v1268_v28 }
 0x36f   :  { %v944_v30 = vsub.f32 %v937_v24, %v943_v29 }
 0x371   :  { %945 = vst [vmem:[%s1670_s5] sm:$0xff] %v944_v30 }

</bundles_post_ra>
